<compile_context>
chip_gen: v7x
topology: tpu7x:2x2x1
jax: 0.10.0
libtpu: 0.0.40
codegen_flags: <defaults>
</compile_context>

<pallas_src>
import jax
import jax.numpy as jnp
from jax.experimental import pallas as pl
from jax.experimental.pallas import tpu as pltpu


def _round_up(x: int, m: int) -> int:
    return ((x + m - 1) // m) * m


def _qfunc_kernel(obs_ref, act_ref,
                  w0a_ref, w0b_ref, b0_ref,
                  w1_ref, b1_ref,
                  w2_ref, b2_ref,
                  o_ref):
    """Fused 3-layer MLP on one batch tile, batch-on-lane layout.

    obs_ref : [BT, obs_dim]    act_ref : [BT, act_dim]
    w0a_ref : [H1, obs_dim]    w0b_ref : [H1, act_dim]   b0_ref : [H1, 1]
    w1_ref  : [H2, H1]         b1_ref  : [H2, 1]
    w2_ref  : [1, H2]          b2_ref  : SMEM scalar (1,)
    o_ref   : [1, BT]          (batch on the lane axis -> dense stores)
    """
    f32 = jnp.float32
    obs = obs_ref[...].astype(f32)      # bf16 inputs upcast in-register; f32 is a no-op
    act = act_ref[...].astype(f32)

    # Layer 1 (split-input replaces cat([obs, act])):  h1 = W0a.obs^T + W0b.act^T + b0
    # Contract both minor dims (q @ k^T pattern) -> [H1, BT], batch on lanes.
    h = jax.lax.dot_general(w0a_ref[...], obs,
                            dimension_numbers=(((1,), (1,)), ((), ())),
                            preferred_element_type=f32)
    h = h + jax.lax.dot_general(w0b_ref[...], act,
                                dimension_numbers=(((1,), (1,)), ((), ())),
                                preferred_element_type=f32)
    h = jnp.maximum(h + b0_ref[...], 0.0)

    # Layer 2: [H2, BT]
    h = jax.lax.dot_general(w1_ref[...], h,
                            dimension_numbers=(((1,), (0,)), ((), ())),
                            preferred_element_type=f32)
    h = jnp.maximum(h + b1_ref[...], 0.0)

    # Head (Identity activation, 1 output unit): lane-dense [1, BT] row.
    q = jax.lax.dot_general(w2_ref[...], h,
                            dimension_numbers=(((1,), (0,)), ((), ())),
                            preferred_element_type=f32)
    o_ref[...] = q + b2_ref[0]


def mlp_qfunction_forward(obs, act, params, *, block_b: int = 4096):
    """q = MLPQFunction(obs, act); returns shape [B].

    obs/act may be f32 or bf16 (bf16 halves the dominant HBM stream);
    accumulation and outputs are f32.
    """
    (w0, b0), (w1, b1), (w2, b2) = params
    B, obs_dim = obs.shape
    act_dim = act.shape[1]
    H1 = w0.shape[1]
    H2 = w1.shape[1]

    # Tiny one-time weight re-layouts (feature dims are small; stays VMEM-resident).
    w0a_t = w0[:obs_dim].T                        # [H1, obs_dim]
    w0b_t = w0[obs_dim:].T                        # [H1, act_dim]
    b0c = b0.reshape(H1, 1)                       # lane-broadcast bias
    w1_t = w1.T                                   # [H2, H1]
    b1c = b1.reshape(H2, 1)
    w2r = w2.reshape(1, H2)                       # valid transpose because out_features == 1
    b2s = b2.reshape(1).astype(jnp.float32)       # scalar head bias -> SMEM

    # --- batch tiling -------------------------------------------------------
    bt = min(int(block_b), _round_up(B, 128))     # no point in tiles larger than B
    if B > 256:
        # keep >= 2 grid steps so v7x can spread tiles over its 2 TensorCores
        bt = min(bt, _round_up((B + 1) // 2, 128))
    bt = max(128, _round_up(bt, 128))

    # VMEM budget: double-buffered, lane-padded (->128) input tiles + transposed
    # [H, BT] activations + output row.  Keep comfortably under v7x's 64 MiB.
    in_itemsize = jnp.dtype(obs.dtype).itemsize
    per_row_bytes = 2 * 2 * 128 * in_itemsize + 2 * (H1 + H2) * 4 + 64
    vmem_budget = 24 * 1024 * 1024
    bt = min(bt, max(128, (vmem_budget // per_row_bytes) // 128 * 128))

    num_tiles = pl.cdiv(B, bt)                    # ragged last tile handled by Pallas masking

    batch_map = lambda i: (i, 0)                  # batch-tiled arrays
    const_map = lambda i: (0, 0)                  # VMEM-resident weights / biases

    q_row = pl.pallas_call(
        _qfunc_kernel,
        out_shape=jax.ShapeDtypeStruct((1, B), jnp.float32),
        grid=(num_tiles,),
        in_specs=[
            pl.BlockSpec((bt, obs_dim), batch_map),
            pl.BlockSpec((bt, act_dim), batch_map),
            pl.BlockSpec((H1, obs_dim), const_map),
            pl.BlockSpec((H1, act_dim), const_map),
            pl.BlockSpec((H1, 1), const_map),
            pl.BlockSpec((H2, H1), const_map),
            pl.BlockSpec((H2, 1), const_map),
            pl.BlockSpec((1, H2), const_map),
            pl.BlockSpec(memory_space=pltpu.MemorySpace.SMEM),   # b2 scalar
        ],
        out_specs=pl.BlockSpec((1, bt), lambda i: (0, i)),
        compiler_params=pltpu.CompilerParams(
            dimension_semantics=("parallel",),        # megacore sharding on v7x
            vmem_limit_bytes=48 * 1024 * 1024,        # > 16/32 MiB scoped defaults, < 64 MiB v7x
        ),
    )(obs, act, w0a_t, w0b_t, b0c, w1_t, b1c, w2r, b2s)

    return q_row[0]                                   # squeeze(-1) of the reference


def init_params(key, obs_dim, act_dim, hidden_sizes):
    """Deterministic init mimicking torch.nn.Linear (U[-1/sqrt(fan_in), +1/sqrt(fan_in)])."""
    sizes = [obs_dim + act_dim] + list(hidden_sizes) + [1]
    params = []
    for j in range(len(sizes) - 1):
        fan_in, fan_out = sizes[j], sizes[j + 1]
        key, kw, kb = jax.random.split(key, 3)
        bound = 1.0 / (fan_in ** 0.5)
        w = jax.random.uniform(kw, (fan_in, fan_out), jnp.float32, -bound, bound)
        b = jax.random.uniform(kb, (1, fan_out), jnp.float32, -bound, bound)
        params.append((w, b))
    return params


def _reference(obs, act, params):
    x = jnp.concatenate([obs.astype(jnp.float32), act.astype(jnp.float32)], axis=-1)
    (w0, b0), (w1, b1), (w2, b2) = params
    h = jnp.maximum(x @ w0 + b0, 0.0)
    h = jnp.maximum(h @ w1 + b1, 0.0)
    return jnp.squeeze(h @ w2 + b2, -1)


if __name__ == "__main__":
    obs_dim, act_dim = 16, 8
    hidden_sizes = (32, 32)

    key = jax.random.PRNGKey(0)
    k_obs, k_act, k_params, k_obs2, k_act2 = jax.random.split(key, 5)
    params = init_params(k_params, obs_dim, act_dim, hidden_sizes)

    # --- small single-tile case (f32) ---
    B = 8
    obs = jax.random.normal(k_obs, (B, obs_dim), jnp.float32)
    act = jax.random.normal(k_act, (B, act_dim), jnp.float32)
    q = mlp_qfunction_forward(obs, act, params)
    jax.block_until_ready(q)
    ref = _reference(obs, act, params)
    assert q.shape == (B,), q.shape
    assert jnp.allclose(q, ref, atol=1e-4, rtol=1e-4), "f32 small-batch mismatch"

    # --- multi-tile + ragged last tile case (exercises grid/masking path) ---
    B2 = 300
    obs2 = jax.random.normal(k_obs2, (B2, obs_dim), jnp.float32)
    act2 = jax.random.normal(k_act2, (B2, act_dim), jnp.float32)
    q2 = mlp_qfunction_forward(obs2, act2, params)
    jax.block_until_ready(q2)
    ref2 = _reference(obs2, act2, params)
    assert q2.shape == (B2,), q2.shape
    assert jnp.allclose(q2, ref2, atol=1e-4, rtol=1e-4), "ragged multi-tile mismatch"

    # --- bf16-input path (halved HBM traffic; f32 accumulation) ---
    q_bf = mlp_qfunction_forward(obs2.astype(jnp.bfloat16),
                                 act2.astype(jnp.bfloat16), params)
    jax.block_until_ready(q_bf)
    assert q_bf.shape == (B2,)
    assert jnp.allclose(q_bf, ref2, atol=1e-1, rtol=1e-1), "bf16-input path mismatch"

    print("KERNEL_OK")
</pallas_src>

<mosaic_0001>
module attributes {stable_mosaic.version = 11 : i64} {
  func.func @_qfunc_kernel(%arg0: i32, %arg1: memref<128x16xf32, #tpu.memory_space<vmem>>, %arg2: memref<128x8xf32, #tpu.memory_space<vmem>>, %arg3: memref<32x16xf32, #tpu.memory_space<vmem>>, %arg4: memref<32x8xf32, #tpu.memory_space<vmem>>, %arg5: memref<32x1xf32, #tpu.memory_space<vmem>>, %arg6: memref<32x32xf32, #tpu.memory_space<vmem>>, %arg7: memref<32x1xf32, #tpu.memory_space<vmem>>, %arg8: memref<1x32xf32, #tpu.memory_space<vmem>>, %arg9: memref<1xf32, #tpu.memory_space<smem>>, %arg10: memref<1x128xf32, #tpu.memory_space<vmem>>) attributes {dimension_semantics = [#tpu.dimension_semantics<parallel>], iteration_bounds = array<i64: 1>, scalar_prefetch = 0 : i64, scratch_operands = 0 : i64, tpu.core_type = #tpu.core_type<tc>, window_params = [{transform_indices = @transform_0, window_bounds = array<i64: 128, 16>}, {transform_indices = @transform_1, window_bounds = array<i64: 128, 8>}, {pipeline_mode = #tpu.pipeline_mode<synchronous>, transform_indices = @transform_2, window_bounds = array<i64: 32, 16>}, {pipeline_mode = #tpu.pipeline_mode<synchronous>, transform_indices = @transform_3, window_bounds = array<i64: 32, 8>}, {pipeline_mode = #tpu.pipeline_mode<synchronous>, transform_indices = @transform_4, window_bounds = array<i64: 32, 1>}, {pipeline_mode = #tpu.pipeline_mode<synchronous>, transform_indices = @transform_5, window_bounds = array<i64: 32, 32>}, {pipeline_mode = #tpu.pipeline_mode<synchronous>, transform_indices = @transform_6, window_bounds = array<i64: 32, 1>}, {pipeline_mode = #tpu.pipeline_mode<synchronous>, transform_indices = @transform_7, window_bounds = array<i64: 1, 32>}, {transform_indices = @transform_8, window_bounds = array<i64: 1>}, {transform_indices = @transform_9, window_bounds = array<i64: 1, 128>}]} {
    %c0 = arith.constant 0 : index
    %c0_0 = arith.constant 0 : index
    %0 = vector.load %arg1[%c0, %c0_0] : memref<128x16xf32, #tpu.memory_space<vmem>>, vector<128x16xf32>
    %c0_1 = arith.constant 0 : index
    %c0_2 = arith.constant 0 : index
    %1 = vector.load %arg2[%c0_1, %c0_2] : memref<128x8xf32, #tpu.memory_space<vmem>>, vector<128x8xf32>
    %c0_3 = arith.constant 0 : index
    %c0_4 = arith.constant 0 : index
    %2 = vector.load %arg3[%c0_3, %c0_4] : memref<32x16xf32, #tpu.memory_space<vmem>>, vector<32x16xf32>
    %cst = arith.constant dense<0.000000e+00> : vector<32x128xf32>
    %3 = tpu.matmul %2, %0, %cst {dimension_numbers = #tpu.dot_dimension_numbers<[1], [1], [0], [0], [0, 0, 1, 0], [], []>} : vector<32x16xf32>, vector<128x16xf32>, vector<32x128xf32> -> vector<32x128xf32>
    %c0_5 = arith.constant 0 : index
    %c0_6 = arith.constant 0 : index
    %4 = vector.load %arg4[%c0_5, %c0_6] : memref<32x8xf32, #tpu.memory_space<vmem>>, vector<32x8xf32>
    %cst_7 = arith.constant dense<0.000000e+00> : vector<32x128xf32>
    %5 = tpu.matmul %4, %1, %cst_7 {dimension_numbers = #tpu.dot_dimension_numbers<[1], [1], [0], [0], [0, 0, 1, 0], [], []>} : vector<32x8xf32>, vector<128x8xf32>, vector<32x128xf32> -> vector<32x128xf32>
    %6 = arith.addf %3, %5 : vector<32x128xf32>
    %c0_8 = arith.constant 0 : index
    %c0_9 = arith.constant 0 : index
    %7 = vector.load %arg5[%c0_8, %c0_9] : memref<32x1xf32, #tpu.memory_space<vmem>>, vector<32x1xf32>
    %8 = vector.broadcast %7 : vector<32x1xf32> to vector<32x128xf32>
    %9 = arith.addf %6, %8 : vector<32x128xf32>
    %cst_10 = arith.constant 0.000000e+00 : f32
    %10 = vector.broadcast %cst_10 : f32 to vector<32x128xf32>
    %11 = arith.maximumf %9, %10 : vector<32x128xf32>
    %c0_11 = arith.constant 0 : index
    %c0_12 = arith.constant 0 : index
    %12 = vector.load %arg6[%c0_11, %c0_12] : memref<32x32xf32, #tpu.memory_space<vmem>>, vector<32x32xf32>
    %cst_13 = arith.constant dense<0.000000e+00> : vector<32x128xf32>
    %13 = tpu.matmul %12, %11, %cst_13 {dimension_numbers = #tpu.dot_dimension_numbers<[1], [0], [0], [1], [0, 0, 1, 1], [], []>} : vector<32x32xf32>, vector<32x128xf32>, vector<32x128xf32> -> vector<32x128xf32>
    %c0_14 = arith.constant 0 : index
    %c0_15 = arith.constant 0 : index
    %14 = vector.load %arg7[%c0_14, %c0_15] : memref<32x1xf32, #tpu.memory_space<vmem>>, vector<32x1xf32>
    %15 = vector.broadcast %14 : vector<32x1xf32> to vector<32x128xf32>
    %16 = arith.addf %13, %15 : vector<32x128xf32>
    %cst_16 = arith.constant 0.000000e+00 : f32
    %17 = vector.broadcast %cst_16 : f32 to vector<32x128xf32>
    %18 = arith.maximumf %16, %17 : vector<32x128xf32>
    %c0_17 = arith.constant 0 : index
    %c0_18 = arith.constant 0 : index
    %19 = vector.load %arg8[%c0_17, %c0_18] : memref<1x32xf32, #tpu.memory_space<vmem>>, vector<1x32xf32>
    %cst_19 = arith.constant dense<0.000000e+00> : vector<1x128xf32>
    %20 = tpu.matmul %19, %18, %cst_19 {dimension_numbers = #tpu.dot_dimension_numbers<[1], [0], [0], [1], [0, 0, 1, 1], [], []>} : vector<1x32xf32>, vector<32x128xf32>, vector<1x128xf32> -> vector<1x128xf32>
    %c0_20 = arith.constant 0 : index
    %21 = memref.load %arg9[%c0_20] : memref<1xf32, #tpu.memory_space<smem>>
    %22 = vector.broadcast %21 : f32 to vector<1x128xf32>
    %23 = arith.addf %20, %22 : vector<1x128xf32>
    %c0_21 = arith.constant 0 : index
    %c0_22 = arith.constant 0 : index
    %24 = vector.load %arg10[%c0_21, %c0_22] : memref<1x128xf32, #tpu.memory_space<vmem>>, vector<1x128xf32>
    tpu.vector_store %arg10[%c0_21, %c0_22], %23 {strides = array<i32>} : memref<1x128xf32, #tpu.memory_space<vmem>>, vector<1x128xf32>,
    return
  }
  func.func @transform_0(%arg0: i32) -> (i32, i32) {
    %c0_i32 = arith.constant 0 : i32
    %c0_i32_0 = arith.constant 0 : i32
    return %arg0, %c0_i32 : i32, i32
  }
  func.func @transform_1(%arg0: i32) -> (i32, i32) {
    %c0_i32 = arith.constant 0 : i32
    %c0_i32_0 = arith.constant 0 : i32
    return %arg0, %c0_i32 : i32, i32
  }
  func.func @transform_2(%arg0: i32) -> (i32, i32) {
    %c0_i32 = arith.constant 0 : i32
    %c0_i32_0 = arith.constant 0 : i32
    %c0_i32_1 = arith.constant 0 : i32
    return %c0_i32, %c0_i32_0 : i32, i32
  }
  func.func @transform_3(%arg0: i32) -> (i32, i32) {
    %c0_i32 = arith.constant 0 : i32
    %c0_i32_0 = arith.constant 0 : i32
    %c0_i32_1 = arith.constant 0 : i32
    return %c0_i32, %c0_i32_0 : i32, i32
  }
  func.func @transform_4(%arg0: i32) -> (i32, i32) {
    %c0_i32 = arith.constant 0 : i32
    %c0_i32_0 = arith.constant 0 : i32
    %c0_i32_1 = arith.constant 0 : i32
    return %c0_i32, %c0_i32_0 : i32, i32
  }
  func.func @transform_5(%arg0: i32) -> (i32, i32) {
    %c0_i32 = arith.constant 0 : i32
    %c0_i32_0 = arith.constant 0 : i32
    %c0_i32_1 = arith.constant 0 : i32
    return %c0_i32, %c0_i32_0 : i32, i32
  }
  func.func @transform_6(%arg0: i32) -> (i32, i32) {
    %c0_i32 = arith.constant 0 : i32
    %c0_i32_0 = arith.constant 0 : i32
    %c0_i32_1 = arith.constant 0 : i32
    return %c0_i32, %c0_i32_0 : i32, i32
  }
  func.func @transform_7(%arg0: i32) -> (i32, i32) {
    %c0_i32 = arith.constant 0 : i32
    %c0_i32_0 = arith.constant 0 : i32
    %c0_i32_1 = arith.constant 0 : i32
    return %c0_i32, %c0_i32_0 : i32, i32
  }
  func.func @transform_8(%arg0: i32) -> i32 {
    %c0_i32 = arith.constant 0 : i32
    %c0_i32_0 = arith.constant 0 : i32
    return %c0_i32 : i32
  }
  func.func @transform_9(%arg0: i32) -> (i32, i32) {
    %c0_i32 = arith.constant 0 : i32
    %c0_i32_0 = arith.constant 0 : i32
    return %c0_i32, %arg0 : i32, i32
  }
}

</mosaic_0001>

<bundles_post_ra>
// kernel: tpu_custom_call.1
= control target key start
LH: loop header
LB: loop body
LE: loop exit
PB: predicated region body
PF: predicated region fallthrough
CT: control target
= control target key end

     0   :  { %vm74_vm0 = vcmask 64512   ;;  %vm220_vm1 = vcmask 130048   ;;  %v963_v7 = vmov 0   ;;  %s1281_s0 = inlined_call_operand.vmem [shape: f32[8,16], index: 0, kind: input, shape index: {}]   ;;  %s1282_s1 = inlined_call_operand.vmem [shape: f32[8,8], index: 1, kind: input, shape index: {}]   ;;  %s1283_s2 = inlined_call_operand.vmem [shape: f32[32,16], index: 2, kind: input, shape index: {}]   ;;  %s1284_s3 = inlined_call_operand.vmem [shape: f32[32,8], index: 3, kind: input, shape index: {}]   ;;  %s1285_s4 = inlined_call_operand.vmem [shape: f32[32,1], index: 4, kind: input, shape index: {}]   ;;  %s1286_s5 = inlined_call_operand.vmem [shape: f32[32,32], index: 5, kind: input, shape index: {}]   ;;  %s1287_s6 = inlined_call_operand.vmem [shape: f32[32,1], index: 6, kind: input, shape index: {}]   ;;  %s1288_s7 = inlined_call_operand.vmem [shape: f32[1,32], index: 7, kind: input, shape index: {}]   ;;  %s1289_s8 = inlined_call_operand.<no memory space> [shape: f32[1], index: 8, kind: input, shape index: {}]   ;;  %s1290_s9 = inlined_call_operand.hbm [shape: f32[1,8], index: 9, kind: output, shape index: {}]  }
   0x1   :  { %v50_v0 = vld [vmem:[%s1282_s1] sm:$0xff]  ;;  %v51_v1 = vld [vmem:[%s1282_s1 + $0x8] sm:$0xff]  ;;  %vm1029_vm2 = vmpackc.low %vm74_vm0, %vm74_vm0  ;;  %937 = vset.pattern.permute.xlu0 %v963_v7  ;;  %938 = vset.pattern.permute.xlu1 %v963_v7 }
   0x2   :  { %v34_v2 = vld [vmem:[%s1281_s0] sm:$0xff]  ;;  %v818_v3 = vpack.c.bf16 %v51_v1, %v50_v0  ;;  %v35_v5 = vld [vmem:[%s1281_s0 + $0x8] sm:$0xff]  ;;  %v52_v6 = vld [vmem:[%s1282_s1 + $0x10] sm:$0xff] }
   0x3   :  { %v866_v8 = vpack.c.bf16 %v35_v5, %v34_v2  ;;  %vm1041_vm3 = vmpackc.low %vm220_vm1, %vm220_vm1  ;;  %v53_v10 = vld [vmem:[%s1282_s1 + $0x18] sm:$0xff]  ;;  %v36_v11 = vld [vmem:[%s1281_s0 + $0x10] sm:$0xff] }
   0x4   :  { %820 = vmatprep.subr.msk.bf16.mxu1 %vm1029_vm2, %v818_v3  ;;  %v824_v12 = vpack.c.bf16 %v53_v10, %v52_v6  ;;  %v37_v13 = vld [vmem:[%s1281_s0 + $0x18] sm:$0xff]  ;;  %v54_v15 = vld [vmem:[%s1282_s1 + $0x20] sm:$0xff]  ;;  %v55_v16 = vld [vmem:[%s1282_s1 + $0x28] sm:$0xff] }
   0x5   :  { %868 = vmatprep.subr.msk.bf16.mxu0 %vm1041_vm3, %v866_v8  ;;  %823 = vmatpush3.bf16.xpose.msk.msra.mxu1 %vm1029_vm2, %v818_v3  ;;  %v872_v14 = vpack.c.bf16 %v37_v13, %v36_v11  ;;  %v38_v17 = vld [vmem:[%s1281_s0 + $0x20] sm:$0xff]  ;;  %v39_v18 = vld [vmem:[%s1281_s0 + $0x28] sm:$0xff]  ;;  %v830_v19 = vpack.c.bf16 %v55_v16, %v54_v15  ;;  %v56_v23 = vld [vmem:[%s1282_s1 + $0x30] sm:$0xff] }
   0x6   :  { %871 = vmatpush3.bf16.xpose.msk.msra.mxu0 %vm1041_vm3, %v866_v8  ;;  %826 = vmatprep.subr.msk.bf16.mxu1 %vm1029_vm2, %v824_v12  ;;  %v878_v20 = vpack.c.bf16 %v39_v18, %v38_v17  ;;  %v70_v21 = vld [vmem:[%s1284_s3] sm:$0xff]  ;;  %v57_v24 = vld [vmem:[%s1282_s1 + $0x38] sm:$0xff]  ;;  %v368_v26 = vld [vmem:[%s1285_s4 + $0x10] sm:$0xff] }
   0x7   :  { %874 = vmatprep.subr.msk.bf16.mxu0 %vm1041_vm3, %v872_v14  ;;  %v66_v22 = vld [vmem:[%s1283_s2] sm:$0xff]  ;;  %749 = vmatprep.mubr.msk.f32.mxu1 %vm74_vm0, %v70_v21  ;;  %v40_v27 = vld [vmem:[%s1281_s0 + $0x30] sm:$0xff]  ;;  %v41_v28 = vld [vmem:[%s1281_s0 + $0x38] sm:$0xff] }
   0x8   :  { %787 = vmatprep.mubr.msk.f32.mxu0 %vm220_vm1, %v66_v22  ;;  %v366_v25 = vld [vmem:[%s1285_s4] sm:$0xff]  ;;  %382 = vperm.xlu1 %938, %v368_v26   ;;  %v367_v29 = vld [vmem:[%s1285_s4 + $0x8] sm:$0xff]  ;;  %v369_v30 = vld [vmem:[%s1285_s4 + $0x18] sm:$0xff] }
   0x9   :  { %372 = vperm.xlu0 %937, %v366_v25  }
   0xd   :  { %829 = vmatpush3.bf16.xpose.msk.msra.mxu1 %vm1029_vm2, %v824_v12 }
   0xe   :  { %877 = vmatpush3.bf16.xpose.msk.msra.mxu0 %vm1041_vm3, %v872_v14  ;;  %832 = vmatprep.subr.msk.bf16.mxu1 %vm1029_vm2, %v830_v19 }
   0xf   :  { %880 = vmatprep.subr.msk.bf16.mxu0 %vm1041_vm3, %v878_v20 }
  0x10   :  { %15 = vsyncpa [#allocation4], 0  ;;  %v836_v31 = vpack.c.bf16 %v57_v24, %v56_v23  ;;  %v884_v32 = vpack.c.bf16 %v41_v28, %v40_v27  ;;  %377 = vperm.xlu0 %937, %v367_v29   ;;  %387 = vperm.xlu1 %938, %v369_v30   ;;  %v402_v33 = vld [vmem:[%s1287_s6] sm:$0xff]  ;;  %v403_v34 = vld [vmem:[%s1287_s6 + $0x8] sm:$0xff]  ;;  %vm426_vm4 = vcmask 261120   ;;  %vm965_vm5 = vmmov 0  }
  0x11   :  { %v58_v35 = vld [vmem:[%s1282_s1 + $0x40] sm:$0xff]  ;;  %v59_v36 = vld [vmem:[%s1282_s1 + $0x48] sm:$0xff]  ;;  %v404_v39 = vld [vmem:[%s1287_s6 + $0x10] sm:$0xff]  ;;  %s967_s23 = smov [#allocation3]  }
  0x12   :  { %v42_v37 = vld [vmem:[%s1281_s0 + $0x40] sm:$0xff]  ;;  %v43_v38 = vld [vmem:[%s1281_s0 + $0x48] sm:$0xff]  ;;  %v405_v40 = vld [vmem:[%s1287_s6 + $0x18] sm:$0xff]  ;;  %v842_v41 = vpack.c.bf16 %v59_v36, %v58_v35  ;;  %s611_s24 = sshll.u32 %s967_s23, 4  ;;  %s612_s24 = int_to_ptr.vmem [resolvable:$true] %s611_s24 }
  0x13   :  { %v890_v42 = vpack.c.bf16 %v43_v38, %v42_v37  ;;  %v60_v43 = vld [vmem:[%s1282_s1 + $0x50] sm:$0xff]  ;;  %v61_v44 = vld [vmem:[%s1282_s1 + $0x58] sm:$0xff]  ;;  %v62_v49 = vld [vmem:[%s1282_s1 + $0x60] sm:$0xff]  ;;  %s939_s25 = scalar_lea.vmem %s612_s24, 16  ;;  %s943_s26 = scalar_lea.vmem %s612_s24, 32 }
  0x14   :  { %408 = vperm.xlu0 %937, %v402_v33   ;;  %413 = vperm.xlu1 %938, %v403_v34   ;;  %v44_v45 = vld [vmem:[%s1281_s0 + $0x50] sm:$0xff]  ;;  %v45_v46 = vld [vmem:[%s1281_s0 + $0x58] sm:$0xff]  ;;  %v848_v47 = vpack.c.bf16 %v61_v44, %v60_v43  ;;  %v63_v50 = vld [vmem:[%s1282_s1 + $0x68] sm:$0xff]  ;;  %v964_v33 = vmov 0.0|0.0   ;;  %v966_v34 = vmov 0.0   ;;  %p940_p0 = scmp.ne.s32.totalorder %s612_s24, %s939_s25  ;;  %p944_p1 = scmp.lt.s32.totalorder %s612_s24, %s612_s24 }
  0x15   :  { %835 = vmatpush3.bf16.xpose.msk.msra.mxu1 %vm1029_vm2, %v830_v19  ;;  %v896_v48 = vpack.c.bf16 %v45_v46, %v44_v45  ;;  %v46_v51 = vld [vmem:[%s1281_s0 + $0x60] sm:$0xff]  ;;  %v47_v52 = vld [vmem:[%s1281_s0 + $0x68] sm:$0xff]  ;;  %v854_v53 = vpack.c.bf16 %v63_v50, %v62_v49  ;;  %v64_v55 = vld [vmem:[%s1282_s1 + $0x70] sm:$0xff]  ;;  %p945_p2 = scmp.lt.s32.totalorder %s943_s26, %s939_s25 }
  0x16   :  { %883 = vmatpush3.bf16.xpose.msk.msra.mxu0 %vm1041_vm3, %v878_v20  ;;  %838 = vmatprep.subr.msk.bf16.mxu1 %vm1029_vm2, %v836_v31  ;;  %v902_v54 = vpack.c.bf16 %v47_v52, %v46_v51  ;;  %v65_v56 = vld [vmem:[%s1282_s1 + $0x78] sm:$0xff]  ;;  %v48_v57 = vld [vmem:[%s1281_s0 + $0x70] sm:$0xff]  ;;  %v71_v61 = vld [vmem:[%s1284_s3 + $0x8] sm:$0xff] }
  0x17   :  { %886 = vmatprep.subr.msk.bf16.mxu0 %vm1041_vm3, %v884_v32  ;;  %v49_v58 = vld [vmem:[%s1281_s0 + $0x78] sm:$0xff]  ;;  %v860_v59 = vpack.c.bf16 %v65_v56, %v64_v55  ;;  %v67_v62 = vld [vmem:[%s1283_s2 + $0x8] sm:$0xff]  ;;  %v72_v63 = vld [vmem:[%s1284_s3 + $0x10] sm:$0xff]  ;;  %p946_p3 = por %p945_p2, %p944_p1 }
  0x18   :  { %418 = vperm.xlu0 %937, %v404_v39   ;;  %423 = vperm.xlu1 %938, %v405_v40   ;;  %v908_v60 = vpack.c.bf16 %v49_v58, %v48_v57  ;;  %v68_v0 = vld [vmem:[%s1283_s2 + $0x10] sm:$0xff]  ;;  %v73_v1 = vld [vmem:[%s1284_s3 + $0x18] sm:$0xff]  ;;  %v398_v3 = vld [vmem:[%s1286_s5] sm:$0xff] }
  0x19   :  { %v69_v2 = vld [vmem:[%s1283_s2 + $0x18] sm:$0xff]  ;;  %v399_v30 = vld [vmem:[%s1286_s5 + $0x8] sm:$0xff]  ;;  %p947_p4 = pnand %p946_p3, %p940_p0 }
  0x1d   :  { %841 = vmatpush3.bf16.xpose.msk.msra.mxu1 %vm1029_vm2, %v836_v31  ;;  %v400_v31 = vld [vmem:[%s1286_s5 + $0x10] sm:$0xff] }
  0x1e   :  { %889 = vmatpush3.bf16.xpose.msk.msra.mxu0 %vm1041_vm3, %v884_v32  ;;  %844 = vmatprep.subr.msk.bf16.mxu1 %vm1029_vm2, %v842_v41  ;;  %v401_v32 = vld [vmem:[%s1286_s5 + $0x18] sm:$0xff] }
  0x1f   :  { %892 = vmatprep.subr.msk.bf16.mxu0 %vm1041_vm3, %v890_v42 }
  0x25   :  { %847 = vmatpush3.bf16.xpose.msk.msra.mxu1 %vm1029_vm2, %v842_v41 }
  0x26   :  { %895 = vmatpush3.bf16.xpose.msk.msra.mxu0 %vm1041_vm3, %v890_v42  ;;  %850 = vmatprep.subr.msk.bf16.mxu1 %vm1029_vm2, %v848_v47 }
  0x27   :  { %898 = vmatprep.subr.msk.bf16.mxu0 %vm1041_vm3, %v896_v48 }
  0x2d   :  { %853 = vmatpush3.bf16.xpose.msk.msra.mxu1 %vm1029_vm2, %v848_v47 }
  0x2e   :  { %901 = vmatpush3.bf16.xpose.msk.msra.mxu0 %vm1041_vm3, %v896_v48  ;;  %856 = vmatprep.subr.msk.bf16.mxu1 %vm1029_vm2, %v854_v53 }
  0x2f   :  { %904 = vmatprep.subr.msk.bf16.mxu0 %vm1041_vm3, %v902_v54 }
  0x35   :  { %859 = vmatpush3.bf16.xpose.msk.msra.mxu1 %vm1029_vm2, %v854_v53  ;;  %v528_v53 = vld [vmem:[%s1288_s7] sm:$0x1] }
  0x36   :  { %907 = vmatpush3.bf16.xpose.msk.msra.mxu0 %vm1041_vm3, %v902_v54  ;;  %862 = vmatprep.subr.msk.bf16.mxu1 %vm1029_vm2, %v860_v59  ;;  %v530_v54 = vstv %s1289_s8 }
  0x37   :  { %910 = vmatprep.subr.msk.bf16.mxu0 %vm1041_vm3, %v908_v60 }
  0x3d   :  { %865 = vmatpush3.bf16.xpose.msk.msra.mxu1 %vm1029_vm2, %v860_v59 }
  0x3e   :  { %913 = vmatpush3.bf16.xpose.msk.msra.mxu0 %vm1041_vm3, %v908_v60  ;;  %922 = vmatprep.subr.bf16.mxu1 %v964_v33 }
  0x44   :  { %750 = vmatmul.mubr.msk.f32.vlgmr.msra.gmra.mrb[0].mxu1 %vm74_vm0, %v71_v61 }
  0x45   :  { %788 = vmatmul.mubr.msk.f32.vlgmr.msra.gmra.mrb[0].mxu0 %vm220_vm1, %v67_v62  ;;  %752 = vmatprep.mubr.msk.f32.mxu1 %vm74_vm0, %v72_v63 }
  0x46   :  { %790 = vmatprep.mubr.msk.f32.mxu0 %vm220_vm1, %v68_v0 }
  0x48   :  { %753 = vmatmul.mubr.msk.f32.gmra.mrb[2].mxu1 %vm74_vm0, %v73_v1 }
  0x49   :  { %791 = vmatmul.mubr.msk.f32.gmra.mrb[2].mxu0 %vm220_vm1, %v69_v2  ;;  %815 = vmatprep.mubr.msk.f32.mxu1 %vm965_vm5, %v966_v34 }
  0x4a   :  { %801 = vmatprep.mubr.msk.f32.mxu0 %vm426_vm4, %v398_v3 }
  0x87   :  { %v383_v5 = vpop.permute.xlu1 %382 }
  0x88   :  { %v373_v4 = vpop.permute.xlu0 %372 }
  0x8f   :  { %v378_v11 = vpop.permute.xlu0 %377  ;;  %v388_v21 = vpop.permute.xlu1 %387 }
  0x93   :  { %v414_v35 = vpop.permute.xlu1 %413  ;;  %v409_v36 = vpop.permute.xlu0 %408 }
  0x97   :  { %v424_v42 = vpop.permute.xlu1 %423  ;;  %v419_v45 = vpop.permute.xlu0 %418 }
 0x117   :  { %v751_v6 = vpop.f32.mrb[0].mxu1 }
 0x118   :  { %v789_v7 = vpop.f32.mrb[0].mxu0  ;;  %v201_v8 = vpop.f32.mrb[1].mxu1 }
 0x119   :  { %v353_v9 = vadd.f32 %v789_v7, %v751_v6  ;;  %v347_v10 = vpop.f32.mrb[1].mxu0 }
 0x11a   :  { %v348_v12 = vadd.f32 %v347_v10, %v201_v8 }
 0x11b   :  { %v391_v13 = vadd.f32 %v378_v11, %v353_v9  ;;  %v754_v14 = vpop.f32.mrb[2].mxu1 }
 0x11c   :  { %v390_v15 = vadd.f32 %v373_v4, %v348_v12  ;;  %v792_v16 = vpop.f32.mrb[2].mxu0  ;;  %v211_v17 = vpop.f32.mrb[3].mxu1 }
 0x11d   :  { %v395_v18 = vmax.f32 %v391_v13, 0.0  ;;  %v363_v19 = vadd.f32 %v792_v16, %v754_v14  ;;  %v357_v20 = vpop.f32.mrb[3].mxu0 }
 0x11e   :  { %v394_v22 = vmax.f32 %v390_v15, 0.0  ;;  %v358_v23 = vadd.f32 %v357_v20, %v211_v17 }
 0x11f   :  { %v393_v24 = vadd.f32 %v388_v21, %v363_v19 }
 0x120   :  { %v392_v25 = vadd.f32 %v383_v5, %v358_v23  ;;  %v914_v26 = vpack.c.bf16 %v395_v18, %v394_v22 }
 0x121   :  { %v397_v27 = vmax.f32 %v393_v24, 0.0 }
 0x122   :  { %v396_v28 = vmax.f32 %v392_v25, 0.0  ;;  %915 = vmatprep.subr.bf16.mxu0 %v914_v26 }
 0x123   :  { %917 = vmatpush3.bf16.msra.mxu0 %v914_v26 }
 0x124   :  { %v918_v29 = vpack.c.bf16 %v397_v27, %v396_v28 }
 0x126   :  { %919 = vmatprep.subr.bf16.mxu0 %v918_v29 }
 0x127   :  { %921 = vmatpush3.bf16.msra.mxu0 %v918_v29 }
 0x12a   :  { %802 = vmatmul.mubr.msk.f32.vlgmr.msra.gmra.mrb[4].mxu0 %vm426_vm4, %v399_v30 }
 0x12b   :  { %804 = vmatprep.mubr.msk.f32.mxu0 %vm426_vm4, %v400_v31 }
 0x12e   :  { %805 = vmatmul.mubr.msk.f32.gmra.mrb[6].mxu0 %vm426_vm4, %v401_v32 }
 0x1fd   :  { %v803_v37 = vpop.f32.mrb[4].mxu0 }
 0x1fe   :  { %v511_v38 = vadd.f32 %v803_v37, %v414_v35  ;;  %v505_v39 = vpop.f32.mrb[5].mxu0 }
 0x1ff   :  { %v506_v40 = vadd.f32 %v505_v39, %v409_v36 }
 0x200   :  { %v525_v41 = vmax.f32 %v511_v38, 0.0 }
 0x201   :  { %v524_v43 = vmax.f32 %v506_v40, 0.0  ;;  %v806_v44 = vpop.f32.mrb[6].mxu0 }
 0x202   :  { %v521_v46 = vadd.f32 %v806_v44, %v424_v42  ;;  %v515_v47 = vpop.f32.mrb[7].mxu0 }
 0x203   :  { %v923_v48 = vpack.c.bf16 %v525_v41, %v524_v43  ;;  %v516_v49 = vadd.f32 %v515_v47, %v419_v45 }
 0x204   :  { %v527_v50 = vmax.f32 %v521_v46, 0.0 }
 0x205   :  { %v526_v51 = vmax.f32 %v516_v49, 0.0  ;;  %924 = vmatpush3.bf16.msra.mxu1 %v923_v48 }
 0x206   :  { %925 = vmatprep.subr.bf16.mxu1 %v964_v33 }
 0x207   :  { %v926_v52 = vpack.c.bf16 %v527_v50, %v526_v51 }
 0x209   :  { %927 = vmatpush3.bf16.msra.mxu1 %v926_v52 }
 0x20c   :  { %816 = vmatmul.mubr.msk.f32.vlgmr.msra.gmra.mrb[4].mxu1 %vm426_vm4, %v528_v53 }
 0x2df   :  { %v600_v55 = vpop.f32.mrb[4].mxu1 }
 0x2e0   :  { %v601_v56 = vadd.f32 %v600_v55, %v530_v54  ;;  %v817_v57 = vpop.f32.mrb[5].mxu1 }
 0x2e2   :  { %604 = vst [vmem:[#allocation3] sm:$0x1] %v601_v56 }
 0x2e3   :  { %950 = shalt.err (!%p947_p4)
}
 0x2e4   :  { %s951_s1 = scalar_lea.hbm %s1290_s9, 16 }
 0x2e5   :  { %p952_p5 = scmp.ne.s32.totalorder %s1290_s9, %s951_s1  ;;  %p955_p6 = scmp.lt.u32.totalorder %s951_s1, %s1290_s9 }
 0x2e7   :  { %p957_p7 = pnand %p955_p6, %p952_p5 }
 0x2e9   :  { %960 = shalt.err (!%p957_p7)
}
 0x2ea   :  { %614 = dma.vmem_to_hbm [thread:$0]  %s612_s24, 16, %s1290_s9, [#allocation4]  }
 0x2eb   :  { %961 = dma.done.wait [#allocation4], 16  }
 0x2ec   :  { %962 = vsyncadd [#allocation4], 4294967280 }
 0x2ed   :  { %618 = vsyncpa [#allocation4], 1 }

</bundles_post_ra>
